<compile_context>
chip_gen: v6e
topology: v6e:2x2x1
jax: 0.10.0
libtpu: 0.0.40
codegen_flags: <defaults>
</compile_context>

<pallas_src>
import functools

import jax
import jax.numpy as jnp
from jax.experimental import pallas as pl
from jax.experimental.pallas import tpu as pltpu


def _vmem_capacity_bytes():
    try:
        return int(pltpu.get_tpu_info().vmem_capacity_bytes)
    except Exception:
        return 64 * 1024 * 1024          # conservative fallback (v7x per-TC VMEM)


def _num_tensorcores():
    try:
        info = pltpu.get_tpu_info()
        for attr in ("num_cores", "num_tensorcores", "tensorcore_count", "cores_per_chip"):
            v = getattr(info, attr, None)
            if v:
                return max(1, int(v))
    except Exception:
        pass
    try:
        kind = jax.devices()[0].device_kind.lower()
        if "v7" in kind:
            return 2
    except Exception:
        pass
    return 1


def _ce_partial_kernel(logits_ref, target_ref, out_ref,
                       m_ref, s_ref, t_ref, acc_ref, *,
                       n_rows, n_cols, tile_n, tile_c, tiles_per_split):
    """Accumulates the sum of per-row cross-entropy for this split of the batch."""
    split = pl.program_id(0)
    step = pl.program_id(1)        # row-tile index within this split
    cstep = pl.program_id(2)       # class-tile index (online logsumexp axis)
    n_steps = pl.num_programs(1)
    n_csteps = pl.num_programs(2)

    @pl.when(jnp.logical_and(step == 0, cstep == 0))
    def _init_split():
        acc_ref[...] = jnp.zeros(acc_ref.shape, jnp.float32)

    @pl.when(cstep == 0)
    def _init_row_tile():
        m_ref[...] = jnp.full(m_ref.shape, -jnp.inf, dtype=jnp.float32)
        s_ref[...] = jnp.zeros(s_ref.shape, jnp.float32)
        t_ref[...] = jnp.zeros(t_ref.shape, jnp.float32)

    x = logits_ref[...]                               # (tile_n, tile_c), native dtype
    tgt = target_ref[...]                             # (tile_n, 1) int32 class ids
    tn, tc = x.shape

    # Global class index of every lane (handles the ragged last class tile).
    cls = cstep * tile_c + jax.lax.broadcasted_iota(jnp.int32, (tn, tc), 1)
    col_ok = cls < n_cols

    # --- online logsumexp update: native-dtype max / select, f32 only in the exp chain ---
    x_m = jnp.where(col_ok, x, jnp.asarray(-jnp.inf, dtype=x.dtype))
    m_loc = jnp.max(x_m, axis=-1, keepdims=True).astype(jnp.float32)
    m_old = m_ref[...]
    m_new = jnp.maximum(m_old, m_loc)
    alpha = jnp.exp(m_old - m_new)                    # rescale previous exp-sum
    p_sum = jnp.sum(jnp.exp((x_m - m_new).astype(jnp.float32)),
                    axis=-1, keepdims=True)
    s_ref[...] = alpha * s_ref[...] + p_sum
    m_ref[...] = m_new

    # Target-logit gather via select (exactly one class tile contributes per row).
    t_ref[...] += jnp.sum(
        jnp.where(cls == tgt, x, jnp.zeros_like(x)).astype(jnp.float32),
        axis=-1, keepdims=True)

    @pl.when(cstep == n_csteps - 1)
    def _row_tile_done():
        ce = m_ref[...] + jnp.log(s_ref[...]) - t_ref[...]      # (tile_n, 1)
        # Mask rows past the true batch size (ragged last tile / phantom split tile).
        # NOTE: masked rows may hold NaN/Inf from unspecified VMEM; select semantics keep
        # them out — never sum `ce` before this mask.
        tile_idx = split * tiles_per_split + step
        row = tile_idx * tile_n + jax.lax.broadcasted_iota(jnp.int32, (tn, 1), 0)
        ce = jnp.where(row < n_rows, ce, 0.0)
        acc_ref[...] += ce                            # VPU add; no per-step scalar reduce

    @pl.when(jnp.logical_and(cstep == n_csteps - 1, step == n_steps - 1))
    def _emit():
        # One aligned (1, 8, 128) block per split; wrapper reads [:, 0, 0].
        out_ref[...] = jnp.full(out_ref.shape, jnp.sum(acc_ref[...]), dtype=jnp.float32)


def focal_loss(logits, targets, gamma=0.0, *, tile_n=None, tile_c=None, num_splits=None):
    """logits: (N, C) float32/bfloat16, targets: (N,) int -> scalar float32 loss."""
    n, c = logits.shape
    targets_2d = targets.reshape(n, 1).astype(jnp.int32)

    itemsize = jnp.dtype(logits.dtype).itemsize
    lane = 128
    padded_c = ((c + lane - 1) // lane) * lane

    # ----- class-axis tiling (online logsumexp when C is large) -----
    tile_c_max = 2048
    if tile_c is None:
        tile_c = c if padded_c <= tile_c_max else tile_c_max
    tile_c = int(tile_c)
    if tile_c >= c:
        tile_c = c                                      # single class block (full dim)
        num_c_tiles = 1
        block_c = padded_c
    else:
        tile_c = max(lane, (tile_c // lane) * lane)     # lane-aligned class blocks
        num_c_tiles = pl.cdiv(c, tile_c)
        block_c = tile_c

    # ----- generation-aware, byte-budgeted row tile (no artificial row cap) -----
    vmem_cap = _vmem_capacity_bytes()
    usable = min(vmem_cap // 2, 64 * 1024 * 1024)
    per_row = (2 * block_c * itemsize       # double-buffered logits block
               + 2 * lane * 4               # double-buffered (row, 1) int32 targets (lane pad)
               + 6 * lane * 4               # m/s/t/acc scratch + small (row, 1) temps
               + 4 * block_c * 4)           # f32/i32 full-block temporaries (exp chain, iota)
    if tile_n is None:
        tile_n = max(8, (usable // per_row // 8) * 8)   # sublane-aligned, budget-limited
    tile_n = int(tile_n)
    if tile_n >= n:
        tile_n = n
    num_tiles = pl.cdiv(n, tile_n)

    # ----- TensorCore split: always 2-way on multi-TC chips (v7x), 1 on v5e/v6e -----
    if num_splits is None:
        num_splits = _num_tensorcores()
    num_splits = int(num_splits)
    if num_tiles < num_splits:
        num_splits = 1
    tiles_per_split = pl.cdiv(num_tiles, num_splits)

    def _row_block(s, i):
        # Odd tile counts get one phantom tile on the last split; clamp the block index
        # (its rows are masked in-kernel) instead of padding N with an HBM copy.
        return jnp.minimum(s * tiles_per_split + i, num_tiles - 1)

    kernel = functools.partial(
        _ce_partial_kernel, n_rows=n, n_cols=c, tile_n=tile_n, tile_c=tile_c,
        tiles_per_split=tiles_per_split)

    out_bytes = num_splits * 8 * 128 * 4
    est_bytes = tile_n * per_row + out_bytes + (1 << 20)
    vmem_limit = int(min(vmem_cap, max(est_bytes + est_bytes // 2, 16 * 1024 * 1024)))

    cost = pl.CostEstimate(
        flops=8 * n * c,
        transcendentals=n * c,                               # exp in the softmax
        bytes_accessed=n * c * itemsize + n * 4 + out_bytes)

    partials = pl.pallas_call(
        kernel,
        out_shape=jax.ShapeDtypeStruct((num_splits, 8, 128), jnp.float32),
        grid=(num_splits, tiles_per_split, num_c_tiles),
        in_specs=[
            pl.BlockSpec((tile_n, tile_c), lambda s, i, ci: (_row_block(s, i), ci)),
            pl.BlockSpec((tile_n, 1), lambda s, i, ci: (_row_block(s, i), 0)),
        ],
        out_specs=pl.BlockSpec((1, 8, 128), lambda s, i, ci: (s, 0, 0)),
        scratch_shapes=[
            pltpu.VMEM((tile_n, 1), jnp.float32),   # running max
            pltpu.VMEM((tile_n, 1), jnp.float32),   # running (rescaled) exp-sum
            pltpu.VMEM((tile_n, 1), jnp.float32),   # target logit
            pltpu.VMEM((tile_n, 1), jnp.float32),   # per-row CE accumulator
        ],
        compiler_params=pltpu.CompilerParams(
            dimension_semantics=("parallel", "arbitrary", "arbitrary"),
            vmem_limit_bytes=vmem_limit),
        cost_estimate=cost,
    )(logits, targets_2d)

    # Tiny finalize on <= num_splits scalars: mean CE, then focal modulation (as in module).
    ce_mean = jnp.sum(partials[:, 0, 0]) / jnp.float32(n)
    p = jnp.exp(-ce_mean)
    return (1.0 - p) ** jnp.float32(gamma) * ce_mean


def _focal_loss_ref(logits, targets, gamma=0.0):
    # Pure-JAX reference for a sanity check.
    logits = logits.astype(jnp.float32)
    logz = jax.nn.logsumexp(logits, axis=-1)
    tgt_logit = jnp.take_along_axis(
        logits, targets[:, None].astype(jnp.int32), axis=-1)[:, 0]
    ce = jnp.mean(logz - tgt_logit)
    p = jnp.exp(-ce)
    return (1.0 - p) ** jnp.float32(gamma) * ce


if __name__ == "__main__":
    key = jax.random.PRNGKey(0)
    k1, k2, k3, k4 = jax.random.split(key, 4)
    gamma = 2.0   # module default is 0; use 2 to exercise the power term

    # Case 1: small f32 batch; single row tile, single class tile, auto split policy.
    N, C = 8, 32
    logits = jax.random.normal(k1, (N, C), dtype=jnp.float32)
    targets = jax.random.randint(k2, (N,), 0, C, dtype=jnp.int32)
    out = jax.block_until_ready(focal_loss(logits, targets, gamma=gamma))
    ref = _focal_loss_ref(logits, targets, gamma=gamma)
    assert jnp.allclose(out, ref, rtol=1e-5, atol=1e-5), (out, ref)

    # Case 2: tiled rows + forced 2-way TensorCore split + bf16 native-dtype path.
    N2, C2 = 64, 32
    logits2 = jax.random.normal(k3, (N2, C2), dtype=jnp.float32)
    targets2 = jax.random.randint(k2, (N2,), 0, C2, dtype=jnp.int32)
    out2 = jax.block_until_ready(
        focal_loss(logits2.astype(jnp.bfloat16), targets2, gamma=gamma,
                   tile_n=16, num_splits=2))
    ref2 = _focal_loss_ref(logits2, targets2, gamma=gamma)
    assert jnp.allclose(out2, ref2, rtol=5e-2, atol=5e-2), (out2, ref2)

    # Case 3: ragged row tiles + ragged class tiles + phantom split tile; exercises the
    # online logsumexp across the class axis and the clamped index_map.
    N3, C3 = 40, 320
    logits3 = jax.random.normal(k4, (N3, C3), dtype=jnp.float32)
    targets3 = jax.random.randint(k2, (N3,), 0, C3, dtype=jnp.int32)
    out3 = jax.block_until_ready(
        focal_loss(logits3, targets3, gamma=gamma, tile_n=16, tile_c=128, num_splits=2))
    ref3 = _focal_loss_ref(logits3, targets3, gamma=gamma)
    assert jnp.allclose(out3, ref3, rtol=1e-5, atol=1e-5), (out3, ref3)

    print("KERNEL_OK")
</pallas_src>

<mosaic_0001>
module attributes {stable_mosaic.version = 11 : i64} {
  func.func @_ce_partial_kernel(%arg0: i32, %arg1: i32, %arg2: i32, %arg3: memref<8x32xf32, #tpu.memory_space<vmem>>, %arg4: memref<8x1xi32, #tpu.memory_space<vmem>>, %arg5: memref<1x8x128xf32, #tpu.memory_space<vmem>>, %arg6: memref<8x1xf32, #tpu.memory_space<vmem>>, %arg7: memref<8x1xf32, #tpu.memory_space<vmem>>, %arg8: memref<8x1xf32, #tpu.memory_space<vmem>>, %arg9: memref<8x1xf32, #tpu.memory_space<vmem>>) attributes {dimension_semantics = [#tpu.dimension_semantics<parallel>, #tpu.dimension_semantics<arbitrary>, #tpu.dimension_semantics<arbitrary>], iteration_bounds = array<i64: 1, 1, 1>, scalar_prefetch = 0 : i64, scratch_operands = 4 : i64, tpu.core_type = #tpu.core_type<tc>, window_params = [{transform_indices = @transform_0, window_bounds = array<i64: 8, 32>}, {transform_indices = @transform_1, window_bounds = array<i64: 8, 1>}, {transform_indices = @transform_2, window_bounds = array<i64: 1, 8, 128>}]} {
    %c0_i32 = arith.constant 0 : i32
    %0 = arith.cmpi eq, %arg1, %c0_i32 : i32
    %c0_i32_0 = arith.constant 0 : i32
    %1 = arith.cmpi eq, %arg2, %c0_i32_0 : i32
    %2 = arith.andi %0, %1 : i1
    %3 = arith.extui %2 : i1 to i32
    %c0_i32_1 = arith.constant 0 : i32
    %4 = arith.cmpi ne, %3, %c0_i32_1 : i32
    scf.if %4 {
      %cst_29 = arith.constant 0.000000e+00 : f32
      %51 = vector.broadcast %cst_29 : f32 to vector<8x1xf32>
      %c0_30 = arith.constant 0 : index
      %c0_31 = arith.constant 0 : index
      %52 = vector.load %arg9[%c0_30, %c0_31] : memref<8x1xf32, #tpu.memory_space<vmem>>, vector<8x1xf32>
      tpu.vector_store %arg9[%c0_30, %c0_31], %51 {strides = array<i32>} : memref<8x1xf32, #tpu.memory_space<vmem>>, vector<8x1xf32>,
    } else {
    }
    %c0_i32_2 = arith.constant 0 : i32
    %5 = arith.cmpi eq, %arg2, %c0_i32_2 : i32
    %6 = arith.extui %5 : i1 to i32
    %c0_i32_3 = arith.constant 0 : i32
    %7 = arith.cmpi ne, %6, %c0_i32_3 : i32
    scf.if %7 {
      %cst_29 = arith.constant 0xFF800000 : f32
      %51 = vector.broadcast %cst_29 : f32 to vector<8x1xf32>
      %c0_30 = arith.constant 0 : index
      %c0_31 = arith.constant 0 : index
      %52 = vector.load %arg6[%c0_30, %c0_31] : memref<8x1xf32, #tpu.memory_space<vmem>>, vector<8x1xf32>
      tpu.vector_store %arg6[%c0_30, %c0_31], %51 {strides = array<i32>} : memref<8x1xf32, #tpu.memory_space<vmem>>, vector<8x1xf32>,
      %cst_32 = arith.constant 0.000000e+00 : f32
      %53 = vector.broadcast %cst_32 : f32 to vector<8x1xf32>
      %c0_33 = arith.constant 0 : index
      %c0_34 = arith.constant 0 : index
      %54 = vector.load %arg7[%c0_33, %c0_34] : memref<8x1xf32, #tpu.memory_space<vmem>>, vector<8x1xf32>
      tpu.vector_store %arg7[%c0_33, %c0_34], %53 {strides = array<i32>} : memref<8x1xf32, #tpu.memory_space<vmem>>, vector<8x1xf32>,
      %cst_35 = arith.constant 0.000000e+00 : f32
      %55 = vector.broadcast %cst_35 : f32 to vector<8x1xf32>
      %c0_36 = arith.constant 0 : index
      %c0_37 = arith.constant 0 : index
      %56 = vector.load %arg8[%c0_36, %c0_37] : memref<8x1xf32, #tpu.memory_space<vmem>>, vector<8x1xf32>
      tpu.vector_store %arg8[%c0_36, %c0_37], %55 {strides = array<i32>} : memref<8x1xf32, #tpu.memory_space<vmem>>, vector<8x1xf32>,
    } else {
    }
    %c0 = arith.constant 0 : index
    %c0_4 = arith.constant 0 : index
    %8 = vector.load %arg3[%c0, %c0_4] : memref<8x32xf32, #tpu.memory_space<vmem>>, vector<8x32xf32>
    %c0_5 = arith.constant 0 : index
    %c0_6 = arith.constant 0 : index
    %9 = vector.load %arg4[%c0_5, %c0_6] : memref<8x1xi32, #tpu.memory_space<vmem>>, vector<8x1xi32>
    %c32_i32 = arith.constant 32 : i32
    %10 = arith.muli %arg2, %c32_i32 : i32
    %11 = tpu.iota {dimensions = array<i32: 1>} : vector<8x32xi32>
    %12 = vector.broadcast %10 : i32 to vector<8x32xi32>
    %13 = arith.addi %12, %11 : vector<8x32xi32>
    %c32_i32_7 = arith.constant 32 : i32
    %14 = vector.broadcast %c32_i32_7 : i32 to vector<8x32xi32>
    %15 = arith.cmpi slt, %13, %14 : vector<8x32xi32>
    %cst = arith.constant 0xFF800000 : f32
    %16 = vector.broadcast %cst : f32 to vector<8x32xf32>
    %17 = arith.select %15, %8, %16 : vector<8x32xi1>, vector<8x32xf32>
    %cst_8 = arith.constant dense<0xFF800000> : vector<8xf32>
    %18 = vector.multi_reduction <maximumf>, %17, %cst_8 [1] : vector<8x32xf32> to vector<8xf32>
    %19 = vector.shape_cast %18 : vector<8xf32> to vector<8x1xf32>
    %c0_9 = arith.constant 0 : index
    %c0_10 = arith.constant 0 : index
    %20 = vector.load %arg6[%c0_9, %c0_10] : memref<8x1xf32, #tpu.memory_space<vmem>>, vector<8x1xf32>
    %21 = arith.maximumf %20, %19 : vector<8x1xf32>
    %22 = arith.subf %20, %21 : vector<8x1xf32>
    %23 = math.exp %22 : vector<8x1xf32>
    %24 = vector.broadcast %21 : vector<8x1xf32> to vector<8x32xf32>
    %25 = arith.subf %17, %24 : vector<8x32xf32>
    %26 = math.exp %25 : vector<8x32xf32>
    %cst_11 = arith.constant dense<0.000000e+00> : vector<8xf32>
    %27 = vector.multi_reduction <add>, %26, %cst_11 [1] : vector<8x32xf32> to vector<8xf32>
    %28 = vector.shape_cast %27 : vector<8xf32> to vector<8x1xf32>
    %c0_12 = arith.constant 0 : index
    %c0_13 = arith.constant 0 : index
    %29 = vector.load %arg7[%c0_12, %c0_13] : memref<8x1xf32, #tpu.memory_space<vmem>>, vector<8x1xf32>
    %30 = arith.mulf %23, %29 : vector<8x1xf32>
    %31 = arith.addf %30, %28 : vector<8x1xf32>
    %c0_14 = arith.constant 0 : index
    %c0_15 = arith.constant 0 : index
    %32 = vector.load %arg7[%c0_14, %c0_15] : memref<8x1xf32, #tpu.memory_space<vmem>>, vector<8x1xf32>
    tpu.vector_store %arg7[%c0_14, %c0_15], %31 {strides = array<i32>} : memref<8x1xf32, #tpu.memory_space<vmem>>, vector<8x1xf32>,
    %c0_16 = arith.constant 0 : index
    %c0_17 = arith.constant 0 : index
    %33 = vector.load %arg6[%c0_16, %c0_17] : memref<8x1xf32, #tpu.memory_space<vmem>>, vector<8x1xf32>
    tpu.vector_store %arg6[%c0_16, %c0_17], %21 {strides = array<i32>} : memref<8x1xf32, #tpu.memory_space<vmem>>, vector<8x1xf32>,
    %c0_18 = arith.constant 0 : index
    %c0_19 = arith.constant 0 : index
    %34 = vector.load %arg8[%c0_18, %c0_19] : memref<8x1xf32, #tpu.memory_space<vmem>>, vector<8x1xf32>
    %35 = vector.broadcast %9 : vector<8x1xi32> to vector<8x32xi32>
    %36 = arith.cmpi eq, %13, %35 : vector<8x32xi32>
    %cst_20 = arith.constant 0.000000e+00 : f32
    %37 = vector.broadcast %cst_20 : f32 to vector<8x32xf32>
    %38 = arith.select %36, %8, %37 : vector<8x32xi1>, vector<8x32xf32>
    %cst_21 = arith.constant dense<0.000000e+00> : vector<8xf32>
    %39 = vector.multi_reduction <add>, %38, %cst_21 [1] : vector<8x32xf32> to vector<8xf32>
    %40 = vector.shape_cast %39 : vector<8xf32> to vector<8x1xf32>
    %41 = arith.addf %34, %40 : vector<8x1xf32>
    %c0_22 = arith.constant 0 : index
    %c0_23 = arith.constant 0 : index
    %42 = vector.load %arg8[%c0_22, %c0_23] : memref<8x1xf32, #tpu.memory_space<vmem>>, vector<8x1xf32>
    tpu.vector_store %arg8[%c0_22, %c0_23], %41 {strides = array<i32>} : memref<8x1xf32, #tpu.memory_space<vmem>>, vector<8x1xf32>,
    %c0_i32_24 = arith.constant 0 : i32
    %43 = arith.cmpi eq, %arg2, %c0_i32_24 : i32
    %44 = arith.extui %43 : i1 to i32
    %c0_i32_25 = arith.constant 0 : i32
    %45 = arith.cmpi ne, %44, %c0_i32_25 : i32
    scf.if %45 {
      %c0_29 = arith.constant 0 : index
      %c0_30 = arith.constant 0 : index
      %51 = vector.load %arg6[%c0_29, %c0_30] : memref<8x1xf32, #tpu.memory_space<vmem>>, vector<8x1xf32>
      %c0_31 = arith.constant 0 : index
      %c0_32 = arith.constant 0 : index
      %52 = vector.load %arg7[%c0_31, %c0_32] : memref<8x1xf32, #tpu.memory_space<vmem>>, vector<8x1xf32>
      %53 = math.log %52 : vector<8x1xf32>
      %54 = arith.addf %51, %53 : vector<8x1xf32>
      %c0_33 = arith.constant 0 : index
      %c0_34 = arith.constant 0 : index
      %55 = vector.load %arg8[%c0_33, %c0_34] : memref<8x1xf32, #tpu.memory_space<vmem>>, vector<8x1xf32>
      %56 = arith.subf %54, %55 : vector<8x1xf32>
      %c1_i32 = arith.constant 1 : i32
      %57 = arith.muli %arg0, %c1_i32 : i32
      %58 = arith.addi %57, %arg1 : i32
      %c8_i32 = arith.constant 8 : i32
      %59 = arith.muli %58, %c8_i32 : i32
      %60 = tpu.iota {dimensions = array<i32: 0>} : vector<8x1xi32>
      %61 = vector.broadcast %59 : i32 to vector<8x1xi32>
      %62 = arith.addi %61, %60 : vector<8x1xi32>
      %c8_i32_35 = arith.constant 8 : i32
      %63 = vector.broadcast %c8_i32_35 : i32 to vector<8x1xi32>
      %64 = arith.cmpi slt, %62, %63 : vector<8x1xi32>
      %cst_36 = arith.constant 0.000000e+00 : f32
      %65 = vector.broadcast %cst_36 : f32 to vector<8x1xf32>
      %66 = arith.select %64, %56, %65 : vector<8x1xi1>, vector<8x1xf32>
      %c0_37 = arith.constant 0 : index
      %c0_38 = arith.constant 0 : index
      %67 = vector.load %arg9[%c0_37, %c0_38] : memref<8x1xf32, #tpu.memory_space<vmem>>, vector<8x1xf32>
      %68 = arith.addf %67, %66 : vector<8x1xf32>
      %c0_39 = arith.constant 0 : index
      %c0_40 = arith.constant 0 : index
      %69 = vector.load %arg9[%c0_39, %c0_40] : memref<8x1xf32, #tpu.memory_space<vmem>>, vector<8x1xf32>
      tpu.vector_store %arg9[%c0_39, %c0_40], %68 {strides = array<i32>} : memref<8x1xf32, #tpu.memory_space<vmem>>, vector<8x1xf32>,
    } else {
    }
    %c0_i32_26 = arith.constant 0 : i32
    %46 = arith.cmpi eq, %arg2, %c0_i32_26 : i32
    %c0_i32_27 = arith.constant 0 : i32
    %47 = arith.cmpi eq, %arg1, %c0_i32_27 : i32
    %48 = arith.andi %46, %47 : i1
    %49 = arith.extui %48 : i1 to i32
    %c0_i32_28 = arith.constant 0 : i32
    %50 = arith.cmpi ne, %49, %c0_i32_28 : i32
    scf.if %50 {
      %c0_29 = arith.constant 0 : index
      %c0_30 = arith.constant 0 : index
      %51 = vector.load %arg9[%c0_29, %c0_30] : memref<8x1xf32, #tpu.memory_space<vmem>>, vector<8x1xf32>
      %52 = vector.shape_cast %51 : vector<8x1xf32> to vector<1x8x1xf32>
      %cst_31 = arith.constant dense<0.000000e+00> : vector<1xf32>
      %53 = vector.multi_reduction <add>, %52, %cst_31 [1, 2] : vector<1x8x1xf32> to vector<1xf32>
      %54 = vector.shape_cast %53 : vector<1xf32> to vector<1x1x1xf32>
      %55 = vector.extract %54[0, 0, 0] : f32 from vector<1x1x1xf32>
      %56 = vector.broadcast %55 : f32 to vector<1x8x128xf32>
      %c0_32 = arith.constant 0 : index
      %c0_33 = arith.constant 0 : index
      %c0_34 = arith.constant 0 : index
      %57 = vector.load %arg5[%c0_32, %c0_33, %c0_34] : memref<1x8x128xf32, #tpu.memory_space<vmem>>, vector<1x8x128xf32>
      tpu.vector_store %arg5[%c0_32, %c0_33, %c0_34], %56 {strides = array<i32>} : memref<1x8x128xf32, #tpu.memory_space<vmem>>, vector<1x8x128xf32>,
    } else {
    }
    return
  }
  func.func @transform_0(%arg0: i32, %arg1: i32, %arg2: i32) -> (i32, i32) {
    %c1_i32 = arith.constant 1 : i32
    %0 = arith.muli %arg0, %c1_i32 : i32
    %1 = arith.addi %0, %arg1 : i32
    %c0_i32 = arith.constant 0 : i32
    %2 = arith.minsi %1, %c0_i32 : i32
    %c0_i32_0 = arith.constant 0 : i32
    return %2, %arg2 : i32, i32
  }
  func.func @transform_1(%arg0: i32, %arg1: i32, %arg2: i32) -> (i32, i32) {
    %c1_i32 = arith.constant 1 : i32
    %0 = arith.muli %arg0, %c1_i32 : i32
    %1 = arith.addi %0, %arg1 : i32
    %c0_i32 = arith.constant 0 : i32
    %2 = arith.minsi %1, %c0_i32 : i32
    %c0_i32_0 = arith.constant 0 : i32
    %c0_i32_1 = arith.constant 0 : i32
    return %2, %c0_i32_0 : i32, i32
  }
  func.func @transform_2(%arg0: i32, %arg1: i32, %arg2: i32) -> (i32, i32, i32) {
    %c0_i32 = arith.constant 0 : i32
    %c0_i32_0 = arith.constant 0 : i32
    %c0_i32_1 = arith.constant 0 : i32
    return %arg0, %c0_i32, %c0_i32_0 : i32, i32, i32
  }
}

</mosaic_0001>

<bundles_post_ra>
// kernel: tpu_custom_call.1
= control target key start
LH: loop header
LB: loop body
LE: loop exit
PB: predicated region body
PF: predicated region fallthrough
CT: control target
= control target key end

     0   :  { %v84_v0 = vlaneseq  ;;  %s265_s0 = inlined_call_operand.vmem [shape: f32[8,32], index: 0, kind: input, shape index: {}]   ;;  %s266_s1 = inlined_call_operand.vmem [shape: s32[8,1], index: 1, kind: input, shape index: {}]   ;;  %s267_s2 = inlined_call_operand.hbm [shape: f32[1,8,128], index: 2, kind: output, shape index: {}]  }
   0x1   :  { %7 = vsyncpa [#allocation7], 0  ;;  %v81_v1 = vld [vmem:[%s265_s0] sm:$0xff]  ;;  %vm90_vm0 = vcmask 261120   ;;  %vm72_vm2 = vcmask 7168   ;;  %v225_v5 = vmov -inf  }
   0x2   :  { %v85_v2 = vand.u32 127, %v84_v0  ;;  %78 = vst.msk [vmem:[#allocation2] sm:$0xff] %vm72_vm2, %v225_v5  ;;  %v226_v6 = vmov 0   ;;  %v82_v7 = vld [vmem:[%s266_s1] sm:$0xff]  ;;  %v227_v8 = vmov 0.0   ;;  %s228_s0 = smov [#allocation6]  }
   0x3   :  { %195 = vset.pattern.permute.xlu0 %v226_v6  ;;  %196 = vset.pattern.permute.xlu1 %v226_v6  ;;  %79 = vst.msk [vmem:[#allocation3] sm:$0xff] %vm72_vm2, %v227_v8  ;;  %73 = vst.msk [vmem:[#allocation5] sm:$0xff] %vm72_vm2, %v227_v8  ;;  %s169_s1 = sshll.u32 %s228_s0, 4  ;;  %s170_s1 = int_to_ptr.vmem [resolvable:$true] %s169_s1 }
   0x4   :  { %vm88_vm1 = vcmp.lt.s32.totalorder %v85_v2, 32  ;;  %118 = vperm.xlu1 %196, %v82_v7   ;;  %80 = vst.msk [vmem:[#allocation4] sm:$0xff] %vm72_vm2, %v227_v8  ;;  %s203_s14 = scalar_lea.vmem %s170_s1, 128  ;;  %p208_p1 = scmp.lt.s32.totalorder %s170_s1, %s170_s1 }
   0x5   :  { %v89_v3 = vsel %vm88_vm1, %v81_v1, -inf  ;;  %p204_p0 = scmp.ne.s32.totalorder %s170_s1, %s203_s14  ;;  %p209_p2 = scmp.lt.s32.totalorder %s203_s14, %s203_s14 }
   0x6   :  { %v91_v4 = vsel %vm90_vm0, %v89_v3, -inf }
   0x7   :  { %92 = vmax.xlane.f32.xlu0 %v91_v4  ;;  %p210_p3 = por %p209_p2, %p208_p1 }
   0x9   :  { %v94_v9 = vld [vmem:[#allocation2] sm:$0xff]  ;;  %p211_p4 = pnand %p210_p3, %p204_p0 }
   0xa   :  { %v110_v23 = vld [vmem:[#allocation3] sm:$0xff]  ;;  %v145_v36 = vld [vmem:[#allocation5] sm:$0xff] }
   0xb   :  { %v116_v27 = vld [vmem:[#allocation4] sm:$0xff] }
  0x7f   :  { %v119_v16 = vpop.permute.xlu1 %118 }
  0x80   :  { %vm120_vm3 = vcmp.eq.s32.totalorder %v85_v2, %v119_v16 }
  0x81   :  { %v121_v18 = vsel %vm120_vm3, %v81_v1, 0.0 }
  0x82   :  { %v122_v20 = vsel %vm90_vm0, %v121_v18, 0.0 }
  0x90   :  { %v93_v10 = vpop.xlane.xlu0 %92 }
  0x91   :  { %v95_v11 = vmax.f32 %v94_v9, %v93_v10 }
  0x93   :  { %v96_v12 = vsub.f32 %v94_v9, %v95_v11  ;;  %115 = vst.msk [vmem:[#allocation2] sm:$0xff] %vm72_vm2, %v95_v11  ;;  %101 = vperm.xlu0 %195, %v95_v11  }
  0x95   :  { %v97_v21 = vmul.f32 1.442695, %v96_v12 }
  0x9a   :  { %v130_v33 = vld [vmem:[#allocation2] sm:$0xff] }
 0x10e   :  { %v102_v13 = vpop.permute.xlu0 %101 }
 0x10f   :  { %v104_v14 = vsub.f32 %v89_v3, %v102_v13 }
 0x111   :  { %v105_v15 = vmul.f32 1.442695, %v104_v14 }
 0x113   :  { %197 = vpow2.f32 %v105_v15 }
 0x114   :  { %199 = vpow2.f32 %v97_v21 }
 0x120   :  { %v198_v17 = vpop.eup %197 }
 0x121   :  { %v107_v19 = vsel %vm90_vm0, %v198_v17, 0.0  ;;  %v200_v22 = vpop.eup %199 }
 0x122   :  { %108 = vadd.xlane.f32.xlu1 %v107_v19  ;;  %v111_v24 = vmul.f32 %v200_v22, %v110_v23 }
 0x126   :  { %123 = vadd.xlane.f32.xlu1 %v122_v20 }
 0x1ab   :  { %v109_v25 = vpop.xlane.xlu1 %108 }
 0x1ac   :  { %v112_v26 = vadd.f32 %v111_v24, %v109_v25 }
 0x1ae   :  { %114 = vst.msk [vmem:[#allocation3] sm:$0xff] %vm72_vm2, %v112_v26 }
 0x1af   :  { %v124_v28 = vpop.xlane.xlu1 %123 }
 0x1b0   :  { %v125_v29 = vadd.f32 %v124_v28, %v116_v27 }
 0x1b2   :  { %126 = vst.msk [vmem:[#allocation4] sm:$0xff] %vm72_vm2, %v125_v29 }
 0x1b5   :  { %v131_v30 = vld [vmem:[#allocation3] sm:$0xff] }
 0x1b6   :  { %201 = vlog2.f32 %v131_v30 }
 0x1b9   :  { %v135_v34 = vld [vmem:[#allocation4] sm:$0xff] }
 0x1c3   :  { %v202_v31 = vpop.eup %201 }
 0x1c4   :  { %v133_v32 = vmul.f32 0.6931472, %v202_v31 }
 0x1c6   :  { %v134_v35 = vadd.f32 %v133_v32, %v130_v33 }
 0x1c8   :  { %v136_v37 = vsub.f32 %v134_v35, %v135_v34 }
 0x1ca   :  { %v146_v38 = vadd.f32 %v145_v36, %v136_v37 }
 0x1cc   :  { %147 = vst.msk [vmem:[#allocation5] sm:$0xff] %vm72_vm2, %v146_v38 }
 0x1d3   :  { %v150_v39 = vld [vmem:[#allocation5] sm:$0xff] }
 0x1d4   :  { %v151_v40 = vsel %vm72_vm2, %v150_v39, 0.0 }
 0x1d5   :  { %152 = vadd.xlane.f32.xlu1 %v151_v40 }
 0x25e   :  { %v153_v41 = vpop.xlane.xlu1 %152 }
 0x25f   :  { %v154_v42 = vrot.slane %v153_v41, 4 }
 0x261   :  { %v155_v43 = vadd.f32 %v154_v42, %v153_v41 }
 0x263   :  { %v156_v44 = vrot.slane %v155_v43, 2 }
 0x265   :  { %v157_v45 = vadd.f32 %v156_v44, %v155_v43 }
 0x267   :  { %v158_v46 = vrot.slane %v157_v45, 1 }
 0x269   :  { %v159_v47 = vadd.f32 %v158_v46, %v157_v45 }
 0x26b   :  { %189 = vpush %v159_v47 }
 0x29c   :  { %s190_s13 = spop %189 }
 0x29d   :  { %v161_v48 = vstv %s190_s13 }
 0x29e   :  { %162 = vst [vmem:[#allocation6] sm:$0xff] %v161_v48 }
 0x29f   :  { %214 = shalt.err (!%p211_p4)
}
 0x2a0   :  { %172 = dma.vmem_to_hbm [thread:$0]  %s170_s1, 128, %s267_s2, [#allocation7]  }
 0x2a1   :  { %223 = dma.done.wait [#allocation7], 128  }
 0x2a2   :  { %224 = vsyncadd [#allocation7], 4294967168 }
 0x2a3   :  { %176 = vsyncpa [#allocation7], 1 }

</bundles_post_ra>
